<compile_context>
chip_gen: v5e
topology: v5e:2x2
jax: 0.10.0
libtpu: 0.0.40
codegen_flags: <defaults>
</compile_context>

<pallas_src>
import functools
import re

import jax
import jax.numpy as jnp
from jax.experimental import pallas as pl
from jax.experimental.pallas import tpu as pltpu


# ----------------------------------------------------------------------------
# Pallas kernel: lane-dense, transpose-free, time-conditioned channel MLP.
#   x_ref : (R, 128)      each 128-lane row packs P consecutive positions x C
#                         channels (P = 128 // C), i.e. the raw (L, C) memory.
#   tb_ref: (B, 1, P*Hd)  per-batch (temb + b1), pre-interleaved; resident.
#   w1_ref: (128, P*Hd)   block-diagonal W1 (position-preserving); resident.
#   w2_ref: (P*Hd, 128)   block-diagonal W2; resident (bf16 on v6e/v7x).
#   b2_ref: (1, 128)      b2 tiled across the P positions of a row; resident.
#   o_ref : (R, 128)      output rows, same interleaved layout as x.
# ----------------------------------------------------------------------------
def _score_kernel(x_ref, tb_ref, w1_ref, w2_ref, b2_ref, o_ref, *, ew_dtype):
    b = pl.program_id(0)
    x = x_ref[...]
    # Channel-mixing matmul #1 (MXU, f32 accumulation).
    h = jnp.dot(x, w1_ref[...], preferred_element_type=jnp.float32)    # (R, P*Hd)
    h = h + tb_ref[b]                                                  # + (temb + b1)
    # Elementwise path: bf16 on v6e/v7x (bf16 VPU/EUP), f32 on v5e.
    h = jax.nn.gelu(h.astype(ew_dtype), approximate=True)
    # Channel-mixing matmul #2 (MXU, f32 accumulation).
    y = jnp.dot(h, w2_ref[...], preferred_element_type=jnp.float32)    # (R, 128)
    o_ref[...] = (y + b2_ref[...]).astype(o_ref.dtype)


# Rows of 128 lanes per block; 256 rows == 8192 positions -> 128 KiB f32 x/y
# tiles and a ~1 MiB (R, P*Hd) intermediate: comfortably inside every
# generation's default scoped-VMEM limit while amortizing per-step overhead.
_TILE_ROWS_LADDER = (256, 128, 64, 32, 16, 8)


def _choose_tile_rows(n_rows: int, batch: int) -> int:
    candidates = [t for t in _TILE_ROWS_LADDER if t <= max(n_rows, 8)]
    for t in candidates:
        # Keep >= 8 total grid steps when possible: feeds both v7x TensorCores
        # (both grid axes are "parallel") and preserves in/out pipelining.
        if batch * pl.cdiv(n_rows, t) >= 8:
            return t
    # Tiny problems: largest tile that fits -> fewest grid steps.
    return candidates[0] if candidates else 8


@functools.lru_cache(maxsize=None)
def _elementwise_dtype():
    """bf16 VPU/EUP exists on TPU v6e / v7x; v5e and older have no bf16 vector
    datapath, so keep the elementwise path in f32 there."""
    try:
        kind = jax.devices()[0].device_kind
        m = re.search(r"(\d+)", kind)
        if m is not None and int(m.group(1)) >= 6:
            return jnp.bfloat16
    except Exception:  # unknown backend -> safe default
        pass
    return jnp.float32


# ----------------------------------------------------------------------------
# Positionwise channel MLP on (B, L, C) with the wrapper transposes fused.
# ----------------------------------------------------------------------------
def _score_channel_mlp(x_nlc, temb, params, ew_dtype):
    B, L, C = x_nlc.shape
    Hd = params["w1"].shape[1]
    if 128 % C != 0:
        # TODO(synk): generalize the lane interleaving (or fall back to a
        # channels-first kernel) for channel counts that do not divide 128.
        raise NotImplementedError("interleaved kernel needs C to divide 128")
    P = 128 // C
    PC, PHd = P * C, P * Hd                      # PC == 128

    # --- interleaved lane-dense view: (B, L, C) -> (B, N, 128), free reshape ---
    Lp = pl.cdiv(L, P) * P
    xr = x_nlc if Lp == L else jnp.pad(x_nlc, ((0, 0), (0, Lp - L), (0, 0)))
    N = Lp // P
    xr = xr.reshape(B, N, PC)

    # --- block-diagonal weights / interleaved biases (tiny, built outside) ---
    eye_p = jnp.eye(P, dtype=params["w1"].dtype)
    w1_big = jnp.einsum("pq,cm->pcqm", eye_p, params["w1"]).reshape(PC, PHd)
    w2_big = jnp.einsum("pq,mc->pmqc", eye_p, params["w2"]).reshape(PHd, PC)
    w2_big = w2_big.astype(ew_dtype)             # bf16 MXU operand on v6e/v7x
    tb_big = jnp.tile(temb + params["b1"][None, :], (1, P))[:, None, :]   # (B,1,PHd)
    b2_big = jnp.tile(params["b2"], P)[None, :]                           # (1, PC)

    tile_r = _choose_tile_rows(N, B)
    n_r = pl.cdiv(N, tile_r)

    itemsize = jnp.dtype(x_nlc.dtype).itemsize
    cost = pl.CostEstimate(
        flops=4 * B * N * PC * PHd,              # two block-diag matmuls
        transcendentals=B * Lp * Hd,             # gelu tanh
        bytes_accessed=2 * B * N * PC * itemsize
        + 4 * (w1_big.size + w2_big.size + tb_big.size + b2_big.size),
    )

    kernel = functools.partial(_score_kernel, ew_dtype=ew_dtype)
    yr = pl.pallas_call(
        kernel,
        out_shape=jax.ShapeDtypeStruct((B, N, PC), x_nlc.dtype),
        grid=(B, n_r),
        in_specs=[
            pl.BlockSpec((None, tile_r, PC), lambda b, r: (b, r, 0)),   # x rows
            pl.BlockSpec((B, 1, PHd), lambda b, r: (0, 0, 0)),          # temb(+b1), resident
            pl.BlockSpec((PC, PHd), lambda b, r: (0, 0)),               # W1 block-diag, resident
            pl.BlockSpec((PHd, PC), lambda b, r: (0, 0)),               # W2 block-diag, resident
            pl.BlockSpec((1, PC), lambda b, r: (0, 0)),                 # b2, resident
        ],
        out_specs=pl.BlockSpec((None, tile_r, PC), lambda b, r: (b, r, 0)),
        compiler_params=pltpu.CompilerParams(
            dimension_semantics=("parallel", "parallel")),
        cost_estimate=cost,
    )(xr, tb_big, w1_big, w2_big, b2_big)

    y = yr.reshape(B, Lp, C)
    return y if Lp == L else y[:, :L, :]


# ----------------------------------------------------------------------------
# Time-embedding glue (cheap, stays in plain JAX outside the kernel).
# ----------------------------------------------------------------------------
def time_embedding(t, freqs, w_t, b_t):
    """t: (B,) -> (B, Hd): sinusoidal features + linear projection."""
    ang = t[:, None] * freqs[None, :]                                # (B, F)
    feat = jnp.concatenate([jnp.sin(ang), jnp.cos(ang)], axis=-1)    # (B, 2F)
    return feat @ w_t + b_t                                          # (B, Hd)


# ----------------------------------------------------------------------------
# MCScoreWrapper.forward :  score(x.transpose(1, 2), t).transpose(1, 2)
# The inner score is a positionwise channel MLP, so the two transposes cancel;
# they are fused into the kernel's interleaved lane layout instead of being
# materialized as HBM transpose copies.
# ----------------------------------------------------------------------------
@jax.jit
def mc_score_wrapper_forward(x, t, params):
    """x: (B, L, C), t: (B,) -> (B, L, C)."""
    temb = time_embedding(t, params["freqs"], params["w_t"], params["b_t"])
    return _score_channel_mlp(x, temb, params, _elementwise_dtype())


# ----------------------------------------------------------------------------
# Deterministic parameter init + pure-JAX reference
# ----------------------------------------------------------------------------
def init_params(key, C, Hd, F):
    ks = jax.random.split(key, 4)
    freqs = jnp.exp(jnp.linspace(0.0, 4.0, F))
    return {
        "freqs": freqs.astype(jnp.float32),
        "w_t": (jax.random.normal(ks[0], (2 * F, Hd)) * 0.1).astype(jnp.float32),
        "b_t": jnp.zeros((Hd,), jnp.float32),
        "w1": (jax.random.normal(ks[1], (C, Hd)) * (1.0 / C) ** 0.5).astype(jnp.float32),
        "b1": jnp.zeros((Hd,), jnp.float32),
        "w2": (jax.random.normal(ks[2], (Hd, C)) * (1.0 / Hd) ** 0.5).astype(jnp.float32),
        "b2": jnp.zeros((C,), jnp.float32),
    }


def reference_forward(x, t, params):
    """Pure-JAX reference for the composed forward (operates in (B, L, C))."""
    temb = time_embedding(t, params["freqs"], params["w_t"], params["b_t"])
    h = jnp.einsum("blc,ch->blh", x, params["w1"]) + params["b1"] + temb[:, None, :]
    h = jax.nn.gelu(h, approximate=True)
    return jnp.einsum("blh,hc->blc", h, params["w2"]) + params["b2"]


if __name__ == "__main__":
    # Small but tiling-exercising shapes: L=975 is not a multiple of P=32
    # (exercises the one-off pad) and N=31 packed rows is not a multiple of
    # the chosen row tile (exercises the pl.cdiv ragged last block). For this
    # B the tile chooser keeps >= 8 grid steps; at production L it scales the
    # tile up to 8192 positions per block.
    B, L, C, Hd, F = 2, 975, 4, 32, 8

    key = jax.random.PRNGKey(0)
    kx, kt, kp = jax.random.split(key, 3)

    x = jax.random.normal(kx, (B, L, C), dtype=jnp.float32)   # (batch, chain length, channels)
    t = jax.random.uniform(kt, (B,), dtype=jnp.float32)       # diffusion time per batch
    params = init_params(kp, C, Hd, F)

    out = jax.block_until_ready(mc_score_wrapper_forward(x, t, params))
    ref = reference_forward(x, t, params)

    # f32 elementwise (v5e and older) -> tight tolerance; bf16 elementwise
    # (v6e / v7x) -> bf16-level tolerance.
    tol = 5e-2 if _elementwise_dtype() == jnp.bfloat16 else 1e-4
    assert out.shape == (B, L, C)
    assert jnp.allclose(out, ref, atol=tol, rtol=tol), "mismatch vs reference"

    print("KERNEL_OK")
</pallas_src>

<mosaic_0001>
module attributes {stable_mosaic.version = 11 : i64} {
  func.func @_score_kernel(%arg0: i32, %arg1: i32, %arg2: memref<1x8x128xf32, #tpu.memory_space<vmem>>, %arg3: memref<2x1x1024xf32, #tpu.memory_space<vmem>>, %arg4: memref<128x1024xf32, #tpu.memory_space<vmem>>, %arg5: memref<1024x128xf32, #tpu.memory_space<vmem>>, %arg6: memref<1x128xf32, #tpu.memory_space<vmem>>, %arg7: memref<1x8x128xf32, #tpu.memory_space<vmem>>) attributes {dimension_semantics = [#tpu.dimension_semantics<parallel>, #tpu.dimension_semantics<parallel>], iteration_bounds = array<i64: 2, 4>, scalar_prefetch = 0 : i64, scratch_operands = 0 : i64, tpu.core_type = #tpu.core_type<tc>, window_params = [{transform_indices = @transform_0, window_bounds = array<i64: 1, 8, 128>}, {pipeline_mode = #tpu.pipeline_mode<synchronous>, transform_indices = @transform_1, window_bounds = array<i64: 2, 1, 1024>}, {pipeline_mode = #tpu.pipeline_mode<synchronous>, transform_indices = @transform_2, window_bounds = array<i64: 128, 1024>}, {pipeline_mode = #tpu.pipeline_mode<synchronous>, transform_indices = @transform_3, window_bounds = array<i64: 1024, 128>}, {pipeline_mode = #tpu.pipeline_mode<synchronous>, transform_indices = @transform_4, window_bounds = array<i64: 1, 128>}, {transform_indices = @transform_5, window_bounds = array<i64: 1, 8, 128>}]} {
    %c0 = arith.constant 0 : index
    %c0_0 = arith.constant 0 : index
    %c0_1 = arith.constant 0 : index
    %0 = vector.load %arg2[%c0, %c0_0, %c0_1] : memref<1x8x128xf32, #tpu.memory_space<vmem>>, vector<1x8x128xf32>
    %1 = vector.shape_cast %0 : vector<1x8x128xf32> to vector<8x128xf32>
    %c0_2 = arith.constant 0 : index
    %c0_3 = arith.constant 0 : index
    %2 = vector.load %arg4[%c0_2, %c0_3] : memref<128x1024xf32, #tpu.memory_space<vmem>>, vector<128x1024xf32>
    %cst = arith.constant dense<0.000000e+00> : vector<8x1024xf32>
    %3 = tpu.matmul %1, %2, %cst {dimension_numbers = #tpu.dot_dimension_numbers<[1], [0], [0], [1], [0, 0, 1, 1], [], []>} : vector<8x128xf32>, vector<128x1024xf32>, vector<8x1024xf32> -> vector<8x1024xf32>
    %4 = arith.index_cast %arg0 : i32 to index
    %c0_4 = arith.constant 0 : index
    %c0_5 = arith.constant 0 : index
    %5 = vector.load %arg3[%4, %c0_4, %c0_5] : memref<2x1x1024xf32, #tpu.memory_space<vmem>>, vector<1x1x1024xf32>
    %6 = vector.shape_cast %5 : vector<1x1x1024xf32> to vector<1x1024xf32>
    %7 = vector.broadcast %6 : vector<1x1024xf32> to vector<8x1024xf32>
    %8 = arith.addf %3, %7 : vector<8x1024xf32>
    %9 = arith.mulf %8, %8 : vector<8x1024xf32>
    %10 = arith.mulf %8, %9 : vector<8x1024xf32>
    %cst_6 = arith.constant 4.471500e-02 : f32
    %11 = vector.broadcast %cst_6 : f32 to vector<8x1024xf32>
    %12 = arith.mulf %11, %10 : vector<8x1024xf32>
    %13 = arith.addf %8, %12 : vector<8x1024xf32>
    %cst_7 = arith.constant 0.797884583 : f32
    %14 = vector.broadcast %cst_7 : f32 to vector<8x1024xf32>
    %15 = arith.mulf %14, %13 : vector<8x1024xf32>
    %16 = math.tanh %15 : vector<8x1024xf32>
    %cst_8 = arith.constant 1.000000e+00 : f32
    %17 = vector.broadcast %cst_8 : f32 to vector<8x1024xf32>
    %18 = arith.addf %17, %16 : vector<8x1024xf32>
    %cst_9 = arith.constant 5.000000e-01 : f32
    %19 = vector.broadcast %cst_9 : f32 to vector<8x1024xf32>
    %20 = arith.mulf %19, %18 : vector<8x1024xf32>
    %21 = arith.mulf %8, %20 : vector<8x1024xf32>
    %c0_10 = arith.constant 0 : index
    %c0_11 = arith.constant 0 : index
    %22 = vector.load %arg5[%c0_10, %c0_11] : memref<1024x128xf32, #tpu.memory_space<vmem>>, vector<1024x128xf32>
    %cst_12 = arith.constant dense<0.000000e+00> : vector<8x128xf32>
    %23 = tpu.matmul %21, %22, %cst_12 {dimension_numbers = #tpu.dot_dimension_numbers<[1], [0], [0], [1], [0, 0, 1, 1], [], []>} : vector<8x1024xf32>, vector<1024x128xf32>, vector<8x128xf32> -> vector<8x128xf32>
    %c0_13 = arith.constant 0 : index
    %c0_14 = arith.constant 0 : index
    %24 = vector.load %arg6[%c0_13, %c0_14] : memref<1x128xf32, #tpu.memory_space<vmem>>, vector<1x128xf32>
    %25 = vector.broadcast %24 : vector<1x128xf32> to vector<8x128xf32>
    %26 = arith.addf %23, %25 : vector<8x128xf32>
    %c0_15 = arith.constant 0 : index
    %c0_16 = arith.constant 0 : index
    %c0_17 = arith.constant 0 : index
    %27 = vector.load %arg7[%c0_15, %c0_16, %c0_17] : memref<1x8x128xf32, #tpu.memory_space<vmem>>, vector<1x8x128xf32>
    %28 = vector.shape_cast %27 : vector<1x8x128xf32> to vector<8x128xf32>
    %29 = vector.shape_cast %26 : vector<8x128xf32> to vector<1x8x128xf32>
    tpu.vector_store %arg7[%c0_15, %c0_16, %c0_17], %29 {strides = array<i32>} : memref<1x8x128xf32, #tpu.memory_space<vmem>>, vector<1x8x128xf32>,
    return
  }
  func.func @transform_0(%arg0: i32, %arg1: i32) -> (i32, i32, i32) {
    %c0_i32 = arith.constant 0 : i32
    %c0_i32_0 = arith.constant 0 : i32
    return %arg0, %arg1, %c0_i32 : i32, i32, i32
  }
  func.func @transform_1(%arg0: i32, %arg1: i32) -> (i32, i32, i32) {
    %c0_i32 = arith.constant 0 : i32
    %c0_i32_0 = arith.constant 0 : i32
    %c0_i32_1 = arith.constant 0 : i32
    %c0_i32_2 = arith.constant 0 : i32
    return %c0_i32, %c0_i32_0, %c0_i32_1 : i32, i32, i32
  }
  func.func @transform_2(%arg0: i32, %arg1: i32) -> (i32, i32) {
    %c0_i32 = arith.constant 0 : i32
    %c0_i32_0 = arith.constant 0 : i32
    %c0_i32_1 = arith.constant 0 : i32
    return %c0_i32, %c0_i32_0 : i32, i32
  }
  func.func @transform_3(%arg0: i32, %arg1: i32) -> (i32, i32) {
    %c0_i32 = arith.constant 0 : i32
    %c0_i32_0 = arith.constant 0 : i32
    %c0_i32_1 = arith.constant 0 : i32
    return %c0_i32, %c0_i32_0 : i32, i32
  }
  func.func @transform_4(%arg0: i32, %arg1: i32) -> (i32, i32) {
    %c0_i32 = arith.constant 0 : i32
    %c0_i32_0 = arith.constant 0 : i32
    %c0_i32_1 = arith.constant 0 : i32
    return %c0_i32, %c0_i32_0 : i32, i32
  }
  func.func @transform_5(%arg0: i32, %arg1: i32) -> (i32, i32, i32) {
    %c0_i32 = arith.constant 0 : i32
    %c0_i32_0 = arith.constant 0 : i32
    return %arg0, %arg1, %c0_i32 : i32, i32, i32
  }
}

</mosaic_0001>

<bundles_post_ra>
// kernel: tile.18
= control target key start
LH: loop header
LB: loop body
LE: loop exit
PB: predicated region body
PF: predicated region fallthrough
CT: control target
= control target key end

     0   :  { %s40_s0 = inlined_call_operand.vmem [shape: f32[4], index: 0, kind: input, shape index: {}]   ;;  %s41_s1 = inlined_call_operand.vmem [shape: f32[32,4], index: 1, kind: output, shape index: {}]  }
   0x1   :  { %v4_v0 = vld [vmem:[%s40_s0] ss:$0 sm:$0xff] }
   0x2   :  { %5 = vst [vmem:[%s41_s1] sm:$0xff] %v4_v0 }
   0x3   :  { %12 = vst [vmem:[%s41_s1 + $0x8] sm:$0xff] %v4_v0 }
   0x4   :  { %13 = vst [vmem:[%s41_s1 + $0x10] sm:$0xff] %v4_v0 }
   0x5   :  { %14 = vst [vmem:[%s41_s1 + $0x18] sm:$0xff] %v4_v0 }

// kernel: tile.19
= control target key start
LH: loop header
LB: loop body
LE: loop exit
PB: predicated region body
PF: predicated region fallthrough
CT: control target
= control target key end

     0   :  { %s259_s10 = smov 124   ;;  %s260_s11 = smov 116   ;;  %vm3_vm0 = vcmask 31744   ;;  %vm9_vm1 = vcmask 1048544   ;;  %vm15_vm2 = vcmask 1015744   ;;  %vm21_vm3 = vcmask 982944   ;;  %s399_s0 = inlined_call_operand.vmem [shape: f32[32,4], index: 0, kind: input, shape index: {}]   ;;  %s400_s1 = inlined_call_operand.vmem [shape: f32[1,128], index: 1, kind: output, shape index: {}]  }
   0x1   :  { %v197_v0 = vld [vmem:[%s399_s0 + $0x1f] sm:$0x1]   ;;  %v199_v1 = vld [vmem:[%s399_s0 + $0x1d] sm:$0x1]   ;;  %v201_v2 = vld [vmem:[%s399_s0 + $0x1b] sm:$0x1]  }
   0x2   :  { %7 = vrot.lane.b32.xlu0 %v197_v0, %s259_s10  ;;  %19 = vrot.lane.b32.xlu1 %v199_v1, %s260_s11  ;;  %s261_s14 = smov 108   ;;  %v198_v3 = vld [vmem:[%s399_s0 + $0x1e] sm:$0x1]   ;;  %v200_v4 = vld [vmem:[%s399_s0 + $0x1c] sm:$0x1]   ;;  %s262_s19 = smov 120  }
   0x3   :  { %31 = vrot.lane.b32.xlu2 %v201_v2, %s261_s14  ;;  %s263_s20 = smov 112   ;;  %v202_v5 = vld [vmem:[%s399_s0 + $0x1a] sm:$0x1]   ;;  %s264_s23 = smov 104   ;;  %v203_v6 = vld [vmem:[%s399_s0 + $0x19] sm:$0x1]  }
   0x4   :  { %v204_v7 = vld [vmem:[%s399_s0 + $0x18] sm:$0x1]   ;;  %s265_s28 = smov 100   ;;  %s266_s29 = smov 96   ;;  %v205_v8 = vld [vmem:[%s399_s0 + $0x17] sm:$0x1]  }
   0x5   :  { %s267_s3 = smov 92   ;;  %v206_v9 = vld [vmem:[%s399_s0 + $0x16] sm:$0x1]   ;;  %v207_v10 = vld [vmem:[%s399_s0 + $0x15] sm:$0x1]   ;;  %s268_s8 = smov 88  }
   0x6   :  { %s269_s9 = smov 84   ;;  %v208_v11 = vld [vmem:[%s399_s0 + $0x14] sm:$0x1]   ;;  %s270_s12 = smov 80   ;;  %v209_v12 = vld [vmem:[%s399_s0 + $0x13] sm:$0x1]  }
   0x7   :  { %v210_v13 = vld [vmem:[%s399_s0 + $0x12] sm:$0x1]   ;;  %s271_s17 = smov 76   ;;  %s272_s18 = smov 72   ;;  %v211_v14 = vld [vmem:[%s399_s0 + $0x11] sm:$0x1]  }
   0x8   :  { %s273_s21 = smov 68   ;;  %v212_v15 = vld [vmem:[%s399_s0 + $0x10] sm:$0x1]   ;;  %v213_v16 = vld [vmem:[%s399_s0 + $0xf] sm:$0x1]   ;;  %s274_s26 = smov 64  }
   0x9   :  { %s275_s27 = smov 60   ;;  %v214_v17 = vld [vmem:[%s399_s0 + $0xe] sm:$0x1]   ;;  %s276_s30 = smov 56   ;;  %v215_v18 = vld [vmem:[%s399_s0 + $0xd] sm:$0x1]  }
   0xa   :  { %13 = vrot.lane.b32.xlu0 %v198_v3, %s262_s19  ;;  %25 = vrot.lane.b32.xlu1 %v200_v4, %s263_s20  ;;  %v216_v19 = vld [vmem:[%s399_s0 + $0xc] sm:$0x1]   ;;  %s277_s6 = smov 52   ;;  %s278_s7 = smov 48   ;;  %v217_v20 = vld [vmem:[%s399_s0 + $0xb] sm:$0x1]  }
   0xb   :  { %37 = vrot.lane.b32.xlu2 %v202_v5, %s264_s23  ;;  %s279_s10 = smov 44   ;;  %v218_v21 = vld [vmem:[%s399_s0 + $0xa] sm:$0x1]   ;;  %v219_v22 = vld [vmem:[%s399_s0 + $0x9] sm:$0x1]   ;;  %s280_s15 = smov 40  }
   0xc   :  { %s281_s16 = smov 36   ;;  %v220_v23 = vld [vmem:[%s399_s0 + $0x8] sm:$0x1]   ;;  %s282_s19 = smov 32   ;;  %v221_v24 = vld [vmem:[%s399_s0 + $0x7] sm:$0x1]  }
   0xd   :  { %v222_v25 = vld [vmem:[%s399_s0 + $0x6] sm:$0x1]   ;;  %s283_s24 = smov 28   ;;  %s284_s25 = smov 24   ;;  %v223_v26 = vld [vmem:[%s399_s0 + $0x5] sm:$0x1]  }
   0xe   :  { %v224_v27 = vld [vmem:[%s399_s0 + $0x4] sm:$0x1]   ;;  %v225_v28 = vld [vmem:[%s399_s0 + $0x3] sm:$0x1]   ;;  %s286_s4 = smov 16   ;;  %s287_s5 = smov 12  }
   0xf   :  { %v226_v29 = vld [vmem:[%s399_s0 + $0x2] sm:$0x1]   ;;  %v227_v30 = vld [vmem:[%s399_s0 + $0x1] sm:$0x1]   ;;  %s289_s11 = smov 4   ;;  %vm27_vm4 = vcmask 950144  }
  0x10   :  { %v2_v31 = vld [vmem:[%s399_s0] sm:$0x1]   ;;  %vm33_vm5 = vcmask 917344   ;;  %vm39_vm6 = vcmask 884544   ;;  %vm45_vm7 = vcmask 851744   ;;  %vm51_vm8 = vcmask 818944  }
  0x11   :  { %4 = vst.msk [vmem:[#allocation0] sm:$0x1] %vm3_vm0, %v2_v31   ;;  %vm57_vm9 = vcmask 786144   ;;  %vm63_vm10 = vcmask 753344   ;;  %vm69_vm11 = vcmask 720544   ;;  %vm75_vm12 = vcmask 687744  }
  0x12   :  { %43 = vrot.lane.b32.xlu0 %v203_v6, %s265_s28  ;;  %49 = vrot.lane.b32.xlu1 %v204_v7, %s266_s29  ;;  %s285_s28 = smov 20   ;;  %vm81_vm13 = vcmask 654944   ;;  %vm87_vm14 = vcmask 622144   ;;  %vm93_vm15 = vcmask 589344   ;;  %vm99_vm0 = vcmask 556544  }
  0x13   :  { %55 = vrot.lane.b32.xlu2 %v205_v8, %s267_s3 }
  0x1a   :  { %61 = vrot.lane.b32.xlu0 %v206_v9, %s268_s8  ;;  %67 = vrot.lane.b32.xlu1 %v207_v10, %s269_s9  ;;  %s288_s8 = smov 8  }
  0x1b   :  { %73 = vrot.lane.b32.xlu2 %v208_v11, %s270_s12 }
  0x22   :  { %79 = vrot.lane.b32.xlu0 %v209_v12, %s271_s17  ;;  %85 = vrot.lane.b32.xlu1 %v210_v13, %s272_s18 }
  0x23   :  { %91 = vrot.lane.b32.xlu2 %v211_v14, %s273_s21 }
  0x2a   :  { %97 = vrot.lane.b32.xlu0 %v212_v15, %s274_s26  ;;  %103 = vrot.lane.b32.xlu1 %v213_v16, %s275_s27 }
  0x2b   :  { %109 = vrot.lane.b32.xlu2 %v214_v17, %s276_s30 }
  0x32   :  { %115 = vrot.lane.b32.xlu0 %v215_v18, %s277_s6  ;;  %121 = vrot.lane.b32.xlu1 %v216_v19, %s278_s7 }
  0x33   :  { %127 = vrot.lane.b32.xlu2 %v217_v20, %s279_s10 }
  0x3a   :  { %133 = vrot.lane.b32.xlu0 %v218_v21, %s280_s15  ;;  %139 = vrot.lane.b32.xlu1 %v219_v22, %s281_s16 }
  0x3b   :  { %145 = vrot.lane.b32.xlu2 %v220_v23, %s282_s19 }
  0x42   :  { %151 = vrot.lane.b32.xlu0 %v221_v24, %s283_s24  ;;  %157 = vrot.lane.b32.xlu1 %v222_v25, %s284_s25 }
  0x43   :  { %163 = vrot.lane.b32.xlu2 %v223_v26, %s285_s28 }
  0x4a   :  { %169 = vrot.lane.b32.xlu0 %v224_v27, %s286_s4  ;;  %175 = vrot.lane.b32.xlu1 %v225_v28, %s287_s5 }
  0x4b   :  { %181 = vrot.lane.b32.xlu2 %v226_v29, %s288_s8 }
  0x52   :  { %187 = vrot.lane.b32.xlu0 %v227_v30, %s289_s11 }
  0x5d   :  { %v32_v32 = vpop.permute.xlu2 %31  }
  0x65   :  { %v38_v33 = vpop.permute.xlu2 %37  }
  0x6d   :  { %v56_v34 = vpop.permute.xlu2 %55  }
  0x74   :  { %v8_v35 = vpop.permute.xlu0 %7   ;;  %v20_v36 = vpop.permute.xlu1 %19  }
  0x75   :  { %10 = vst.msk [vmem:[#allocation0] sm:$0x1] %vm9_vm1, %v8_v35   ;;  %v74_v37 = vpop.permute.xlu2 %73   ;;  %vm105_vm1 = vcmask 523744  }
  0x7c   :  { %v14_v38 = vpop.permute.xlu0 %13   ;;  %v26_v39 = vpop.permute.xlu1 %25  }
  0x7d   :  { %16 = vst.msk [vmem:[#allocation0] sm:$0x1] %vm15_vm2, %v14_v38   ;;  %v92_v40 = vpop.permute.xlu2 %91   ;;  %vm111_vm2 = vcmask 490944  }
  0x7e   :  { %22 = vst.msk [vmem:[#allocation0] sm:$0x1] %vm21_vm3, %v20_v36   ;;  %vm117_vm3 = vcmask 458144  }
  0x7f   :  { %28 = vst.msk [vmem:[#allocation0] sm:$0x1] %vm27_vm4, %v26_v39   ;;  %vm123_vm4 = vcmask 425344  }
  0x80   :  { %34 = vst.msk [vmem:[#allocation0] sm:$0x1] %vm33_vm5, %v32_v32   ;;  %vm129_vm5 = vcmask 392544  }
  0x81   :  { %40 = vst.msk [vmem:[#allocation0] sm:$0x1] %vm39_vm6, %v38_v33   ;;  %vm135_vm6 = vcmask 359744  }
  0x84   :  { %v44_v41 = vpop.permute.xlu0 %43   ;;  %v50_v42 = vpop.permute.xlu1 %49  }
  0x85   :  { %46 = vst.msk [vmem:[#allocation0] sm:$0x1] %vm45_vm7, %v44_v41   ;;  %v110_v43 = vpop.permute.xlu2 %109   ;;  %vm141_vm7 = vcmask 326944  }
  0x86   :  { %52 = vst.msk [vmem:[#allocation0] sm:$0x1] %vm51_vm8, %v50_v42   ;;  %vm147_vm8 = vcmask 294144  }
  0x87   :  { %58 = vst.msk [vmem:[#allocation0] sm:$0x1] %vm57_vm9, %v56_v34   ;;  %vm153_vm9 = vcmask 261344  }
  0x8c   :  { %v62_v44 = vpop.permute.xlu0 %61   ;;  %v68_v45 = vpop.permute.xlu1 %67  }
  0x8d   :  { %64 = vst.msk [vmem:[#allocation0] sm:$0x1] %vm63_vm10, %v62_v44   ;;  %v128_v46 = vpop.permute.xlu2 %127   ;;  %vm159_vm10 = vcmask 228544  }
  0x8e   :  { %70 = vst.msk [vmem:[#allocation0] sm:$0x1] %vm69_vm11, %v68_v45   ;;  %vm165_vm11 = vcmask 195744  }
  0x8f   :  { %76 = vst.msk [vmem:[#allocation0] sm:$0x1] %vm75_vm12, %v74_v37   ;;  %vm171_vm12 = vcmask 162944  }
  0x94   :  { %v80_v47 = vpop.permute.xlu0 %79   ;;  %v86_v48 = vpop.permute.xlu1 %85  }
  0x95   :  { %82 = vst.msk [vmem:[#allocation0] sm:$0x1] %vm81_vm13, %v80_v47   ;;  %v146_v49 = vpop.permute.xlu2 %145   ;;  %vm177_vm13 = vcmask 130144  }
  0x96   :  { %88 = vst.msk [vmem:[#allocation0] sm:$0x1] %vm87_vm14, %v86_v48   ;;  %vm183_vm14 = vcmask 97344  }
  0x97   :  { %94 = vst.msk [vmem:[#allocation0] sm:$0x1] %vm93_vm15, %v92_v40   ;;  %vm189_vm15 = vcmask 64544  }
  0x9c   :  { %v98_v50 = vpop.permute.xlu0 %97   ;;  %v104_v51 = vpop.permute.xlu1 %103  }
  0x9d   :  { %100 = vst.msk [vmem:[#allocation0] sm:$0x1] %vm99_vm0, %v98_v50   ;;  %v164_v52 = vpop.permute.xlu2 %163  }
  0x9e   :  { %106 = vst.msk [vmem:[#allocation0] sm:$0x1] %vm105_vm1, %v104_v51  }
  0x9f   :  { %112 = vst.msk [vmem:[#allocation0] sm:$0x1] %vm111_vm2, %v110_v43  }
  0xa4   :  { %v116_v53 = vpop.permute.xlu0 %115   ;;  %v122_v54 = vpop.permute.xlu1 %121  }
  0xa5   :  { %118 = vst.msk [vmem:[#allocation0] sm:$0x1] %vm117_vm3, %v116_v53   ;;  %v182_v55 = vpop.permute.xlu2 %181  }
  0xa6   :  { %124 = vst.msk [vmem:[#allocation0] sm:$0x1] %vm123_vm4, %v122_v54  }
  0xa7   :  { %130 = vst.msk [vmem:[#allocation0] sm:$0x1] %vm129_vm5, %v128_v46  }
  0xac   :  { %v134_v56 = vpop.permute.xlu0 %133   ;;  %v140_v57 = vpop.permute.xlu1 %139  }
  0xad   :  { %136 = vst.msk [vmem:[#allocation0] sm:$0x1] %vm135_vm6, %v134_v56  }
  0xae   :  { %142 = vst.msk [vmem:[#allocation0] sm:$0x1] %vm141_vm7, %v140_v57  }
  0xaf   :  { %148 = vst.msk [vmem:[#allocation0] sm:$0x1] %vm147_vm8, %v146_v49  }
  0xb4   :  { %v152_v58 = vpop.permute.xlu0 %151   ;;  %v158_v59 = vpop.permute.xlu1 %157  }
  0xb5   :  { %154 = vst.msk [vmem:[#allocation0] sm:$0x1] %vm153_vm9, %v152_v58  }
  0xb6   :  { %160 = vst.msk [vmem:[#allocation0] sm:$0x1] %vm159_vm10, %v158_v59  }
  0xb7   :  { %166 = vst.msk [vmem:[#allocation0] sm:$0x1] %vm165_vm11, %v164_v52  }
  0xbc   :  { %v170_v60 = vpop.permute.xlu0 %169   ;;  %v176_v61 = vpop.permute.xlu1 %175  }
  0xbd   :  { %172 = vst.msk [vmem:[#allocation0] sm:$0x1] %vm171_vm12, %v170_v60  }
  0xbe   :  { %178 = vst.msk [vmem:[#allocation0] sm:$0x1] %vm177_vm13, %v176_v61  }
  0xbf   :  { %184 = vst.msk [vmem:[#allocation0] sm:$0x1] %vm183_vm14, %v182_v55  }
  0xc4   :  { %v188_v62 = vpop.permute.xlu0 %187  }
  0xc5   :  { %190 = vst.msk [vmem:[#allocation0] sm:$0x1] %vm189_vm15, %v188_v62  }
  0xcc   :  { %v193_v63 = vld [vmem:[#allocation0] sm:$0x1] }
  0xcd   :  { %196 = vst [vmem:[%s400_s1] sm:$0x1] %v193_v63 }

// kernel: mc_score_wrapper_forward.1
= control target key start
LH: loop header
LB: loop body
LE: loop exit
PB: predicated region body
PF: predicated region fallthrough
CT: control target
= control target key end

     0   :  { %s1157_s18 = smov 0   ;;  %s1159_s19 = smov 0   ;;  %s2053_s0 = inlined_call_operand.vmem [shape: f32[2,31,128], index: 0, kind: input, shape index: {}]   ;;  %s2054_s1 = inlined_call_operand.vmem [shape: f32[2,1,1024], index: 1, kind: input, shape index: {}]   ;;  %s2055_s2 = inlined_call_operand.vmem [shape: f32[128,1024], index: 2, kind: input, shape index: {}]   ;;  %s2056_s3 = inlined_call_operand.vmem [shape: f32[1024,128], index: 3, kind: input, shape index: {}]   ;;  %s2057_s4 = inlined_call_operand.vmem [shape: f32[1,128], index: 4, kind: input, shape index: {}]   ;;  %s2058_s5 = inlined_call_operand.vmem [shape: f32[2,31,128], index: 5, kind: output, shape index: {}]  }
   0x1   :  { %s1161_s20 = smov 0   ;;  %s1163_s21 = smov 0  }
   0x2   :  { %s1165_s22 = smov 0  }
   0x3 LB: > { %s24_s23 = sadd.s32 1, %s1117_s20  ;;  %s27_s24 = sadd.s32 1, %s1121_s21  ;;  %s1125_s22 = sphi %s1165_s22, %s15_s22   ;;  %s1121_s21 = sphi %s1163_s21, %s2062_s21   ;;  %s1117_s20 = sphi %s1161_s20, %s2061_s20   ;;  %s1113_s19 = sphi %s1159_s19, %s2060_s19   ;;  %s1109_s18 = sphi %s1157_s18, %s2059_s18  }
   0x4   : > { %p25_p0 = scmp.ge.s32.totalorder %s24_s23, 4  ;;  %p1022_p1 = scmp.ge.s32.totalorder %s1125_s22, 1 }
   0x5   : > { %p206_p2 = scmp.lt.s32.totalorder %s1125_s22, 9 }
   0x6   : > { %s2064_s23 = smov (%p25_p0, %s24_s23), 0  ;;  %s2066_s24 = smov (!%p25_p0, %s27_s24), %s1121_s21 }
   0x7   : > { %p207_p3 = pnand %p1022_p1, %p206_p2  ;;  %p29_p4 = scmp.ge.s32.totalorder %s2066_s24, 2 }
   0x8   : > { %p240_p5 = scmp.lt.s32.totalorder (!%p207_p3), %s1113_s19, 1  ;;  %p242_p6 = scmp.lt.s32.totalorder (!%p207_p3), %s1109_s18, 3 }
   0x9   : > { %s2068_s24 = smov (%p29_p4, %s2066_s24), 0  ;;  %210 = sbr.rel (%p207_p3) target bundleno = 376 (0x178), region = 40 }
   0xa   : > { %s1027_s12 = sshll.u32 (!%p207_p3), %s1113_s19, 3 }
   0xb   : > { %s386_s13 = scalar_lea.vmem (!%p207_p3), %s2054_s1, %s1027_s12 }
   0xe   : > { %v377_v0 = vld [vmem:[%s2055_s2 + $0x3c0] sm:$0xff]  ;;  %v378_v1 = vld [vmem:[%s2055_s2 + $0x3c8] sm:$0xff]  ;;  %v379_v2 = vld [vmem:[%s2055_s2 + $0x3d0] sm:$0xff]  ;;  %s1310_s29 = scalar_select %p240_p5, %s1113_s19, 1 }
   0xf   : > { %405 = vmatpush.msra.mxu0 %v377_v0  ;;  %425 = vmatpush.msra.mxu1 %v378_v1  ;;  %v380_v3 = vld [vmem:[%s2055_s2 + $0x3d8] sm:$0xff]  ;;  %v369_v4 = vld [vmem:[%s2055_s2 + $0x380] sm:$0xff]  ;;  %v370_v5 = vld [vmem:[%s2055_s2 + $0x388] sm:$0xff]  ;;  %s2070_s18 = smov (!%p242_p6, %s1109_s18), 3 }
  0x10   : > { %445 = vmatpush.msra.mxu2 %v379_v2  ;;  %465 = vmatpush.msra.mxu3 %v380_v3  ;;  %v371_v6 = vld [vmem:[%s2055_s2 + $0x390] sm:$0xff]  ;;  %v372_v7 = vld [vmem:[%s2055_s2 + $0x398] sm:$0xff]  ;;  %v361_v8 = vld [vmem:[%s2055_s2 + $0x340] sm:$0xff]  ;;  %s1023_s28 = sshll.u32 %s1310_s29, 2 }
  0x11   : > { %406 = vmatpush.msra.mxu0 %v369_v4  ;;  %426 = vmatpush.msra.mxu1 %v370_v5  ;;  %v362_v9 = vld [vmem:[%s2055_s2 + $0x348] sm:$0xff]  ;;  %v363_v10 = vld [vmem:[%s2055_s2 + $0x350] sm:$0xff]  ;;  %v364_v11 = vld [vmem:[%s2055_s2 + $0x358] sm:$0xff]  ;;  %s1358_s16 = sadd.s32 %s1023_s28, %s2070_s18 }
  0x12   : > { %446 = vmatpush.msra.mxu2 %v371_v6  ;;  %466 = vmatpush.msra.mxu3 %v372_v7  ;;  %v353_v12 = vld [vmem:[%s2055_s2 + $0x300] sm:$0xff]  ;;  %v354_v13 = vld [vmem:[%s2055_s2 + $0x308] sm:$0xff]  ;;  %v355_v14 = vld [vmem:[%s2055_s2 + $0x310] sm:$0xff]  ;;  %s1024_s11 = sshll.u32 %s1358_s16, 3 }
  0x13   : > { %407 = vmatpush.msra.mxu0 %v361_v8  ;;  %427 = vmatpush.msra.mxu1 %v362_v9  ;;  %v356_v15 = vld [vmem:[%s2055_s2 + $0x318] sm:$0xff]  ;;  %v345_v16 = vld [vmem:[%s2055_s2 + $0x2c0] sm:$0xff]  ;;  %v346_v17 = vld [vmem:[%s2055_s2 + $0x2c8] sm:$0xff]  ;;  %s247_s8 = scalar_lea.vmem %s2053_s0, %s1024_s11  ;;  %s255_s19 = scalar_lea.vmem %s2058_s5, %s1024_s11 }
  0x14   : > { %447 = vmatpush.msra.mxu2 %v363_v10  ;;  %467 = vmatpush.msra.mxu3 %v364_v11  ;;  %v347_v18 = vld [vmem:[%s2055_s2 + $0x2d0] sm:$0xff]  ;;  %v348_v19 = vld [vmem:[%s2055_s2 + $0x2d8] sm:$0xff]  ;;  %v337_v20 = vld [vmem:[%s2055_s2 + $0x280] sm:$0xff] }
  0x15   : > { %408 = vmatpush.msra.mxu0 %v353_v12  ;;  %428 = vmatpush.msra.mxu1 %v354_v13  ;;  %v338_v21 = vld [vmem:[%s2055_s2 + $0x288] sm:$0xff]  ;;  %v339_v22 = vld [vmem:[%s2055_s2 + $0x290] sm:$0xff]  ;;  %v340_v23 = vld [vmem:[%s2055_s2 + $0x298] sm:$0xff] }
  0x16   : > { %448 = vmatpush.msra.mxu2 %v355_v14  ;;  %468 = vmatpush.msra.mxu3 %v356_v15  ;;  %v329_v24 = vld [vmem:[%s2055_s2 + $0x240] sm:$0xff]  ;;  %v330_v25 = vld [vmem:[%s2055_s2 + $0x248] sm:$0xff]  ;;  %v331_v26 = vld [vmem:[%s2055_s2 + $0x250] sm:$0xff] }
  0x17   : > { %409 = vmatpush.msra.mxu0 %v345_v16  ;;  %429 = vmatpush.msra.mxu1 %v346_v17  ;;  %v332_v27 = vld [vmem:[%s2055_s2 + $0x258] sm:$0xff]  ;;  %v321_v28 = vld [vmem:[%s2055_s2 + $0x200] sm:$0xff]  ;;  %v322_v29 = vld [vmem:[%s2055_s2 + $0x208] sm:$0xff] }
  0x18   : > { %449 = vmatpush.msra.mxu2 %v347_v18  ;;  %469 = vmatpush.msra.mxu3 %v348_v19  ;;  %v323_v30 = vld [vmem:[%s2055_s2 + $0x210] sm:$0xff]  ;;  %v324_v31 = vld [vmem:[%s2055_s2 + $0x218] sm:$0xff]  ;;  %v313_v32 = vld [vmem:[%s2055_s2 + $0x1c0] sm:$0xff] }
  0x19   : > { %410 = vmatpush.msra.mxu0 %v337_v20  ;;  %430 = vmatpush.msra.mxu1 %v338_v21  ;;  %v314_v33 = vld [vmem:[%s2055_s2 + $0x1c8] sm:$0xff]  ;;  %v315_v34 = vld [vmem:[%s2055_s2 + $0x1d0] sm:$0xff]  ;;  %v316_v35 = vld [vmem:[%s2055_s2 + $0x1d8] sm:$0xff] }
  0x1a   : > { %450 = vmatpush.msra.mxu2 %v339_v22  ;;  %470 = vmatpush.msra.mxu3 %v340_v23  ;;  %v305_v36 = vld [vmem:[%s2055_s2 + $0x180] sm:$0xff]  ;;  %v306_v37 = vld [vmem:[%s2055_s2 + $0x188] sm:$0xff]  ;;  %v307_v38 = vld [vmem:[%s2055_s2 + $0x190] sm:$0xff] }
  0x1b   : > { %411 = vmatpush.msra.mxu0 %v329_v24  ;;  %431 = vmatpush.msra.mxu1 %v330_v25  ;;  %v308_v39 = vld [vmem:[%s2055_s2 + $0x198] sm:$0xff]  ;;  %v297_v40 = vld [vmem:[%s2055_s2 + $0x140] sm:$0xff]  ;;  %v298_v41 = vld [vmem:[%s2055_s2 + $0x148] sm:$0xff] }
  0x1c   : > { %451 = vmatpush.msra.mxu2 %v331_v26  ;;  %471 = vmatpush.msra.mxu3 %v332_v27  ;;  %v299_v42 = vld [vmem:[%s2055_s2 + $0x150] sm:$0xff]  ;;  %v300_v43 = vld [vmem:[%s2055_s2 + $0x158] sm:$0xff]  ;;  %v289_v44 = vld [vmem:[%s2055_s2 + $0x100] sm:$0xff] }
  0x1d   : > { %412 = vmatpush.msra.mxu0 %v321_v28  ;;  %432 = vmatpush.msra.mxu1 %v322_v29  ;;  %v290_v45 = vld [vmem:[%s2055_s2 + $0x108] sm:$0xff]  ;;  %v291_v46 = vld [vmem:[%s2055_s2 + $0x110] sm:$0xff]  ;;  %v292_v47 = vld [vmem:[%s2055_s2 + $0x118] sm:$0xff] }
  0x1e   : > { %452 = vmatpush.msra.mxu2 %v323_v30  ;;  %472 = vmatpush.msra.mxu3 %v324_v31  ;;  %v281_v48 = vld [vmem:[%s2055_s2 + $0xc0] sm:$0xff]  ;;  %v282_v49 = vld [vmem:[%s2055_s2 + $0xc8] sm:$0xff]  ;;  %v283_v50 = vld [vmem:[%s2055_s2 + $0xd0] sm:$0xff] }
  0x1f   : > { %413 = vmatpush.msra.mxu0 %v313_v32  ;;  %433 = vmatpush.msra.mxu1 %v314_v33  ;;  %v284_v51 = vld [vmem:[%s2055_s2 + $0xd8] sm:$0xff]  ;;  %v273_v52 = vld [vmem:[%s2055_s2 + $0x80] sm:$0xff]  ;;  %v274_v53 = vld [vmem:[%s2055_s2 + $0x88] sm:$0xff] }
  0x20   : > { %453 = vmatpush.msra.mxu2 %v315_v34  ;;  %473 = vmatpush.msra.mxu3 %v316_v35  ;;  %v275_v54 = vld [vmem:[%s2055_s2 + $0x90] sm:$0xff]  ;;  %v276_v55 = vld [vmem:[%s2055_s2 + $0x98] sm:$0xff]  ;;  %v265_v56 = vld [vmem:[%s2055_s2 + $0x40] sm:$0xff] }
  0x21   : > { %414 = vmatpush.msra.mxu0 %v305_v36  ;;  %434 = vmatpush.msra.mxu1 %v306_v37  ;;  %v266_v57 = vld [vmem:[%s2055_s2 + $0x48] sm:$0xff]  ;;  %v267_v58 = vld [vmem:[%s2055_s2 + $0x50] sm:$0xff]  ;;  %v268_v59 = vld [vmem:[%s2055_s2 + $0x58] sm:$0xff] }
  0x22   : > { %454 = vmatpush.msra.mxu2 %v307_v38  ;;  %474 = vmatpush.msra.mxu3 %v308_v39  ;;  %v257_v60 = vld [vmem:[%s2055_s2] sm:$0xff]  ;;  %v258_v61 = vld [vmem:[%s2055_s2 + $0x8] sm:$0xff]  ;;  %v259_v62 = vld [vmem:[%s2055_s2 + $0x10] sm:$0xff] }
  0x23   : > { %415 = vmatpush.msra.mxu0 %v297_v40  ;;  %435 = vmatpush.msra.mxu1 %v298_v41  ;;  %v260_v63 = vld [vmem:[%s2055_s2 + $0x18] sm:$0xff]  ;;  %v381_v0 = vld [vmem:[%s2055_s2 + $0x3e0] sm:$0xff]  ;;  %v382_v1 = vld [vmem:[%s2055_s2 + $0x3e8] sm:$0xff] }
  0x24   : > { %455 = vmatpush.msra.mxu2 %v299_v42  ;;  %475 = vmatpush.msra.mxu3 %v300_v43  ;;  %v383_v2 = vld [vmem:[%s2055_s2 + $0x3f0] sm:$0xff]  ;;  %v384_v3 = vld [vmem:[%s2055_s2 + $0x3f8] sm:$0xff]  ;;  %v1414_v4 = vld [vmem:[%s247_s8] sm:$0xff] }
  0x25   : > { %416 = vmatpush.msra.mxu0 %v289_v44  ;;  %436 = vmatpush.msra.mxu1 %v290_v45  ;;  %v373_v5 = vld [vmem:[%s2055_s2 + $0x3a0] sm:$0xff]  ;;  %v374_v6 = vld [vmem:[%s2055_s2 + $0x3a8] sm:$0xff]  ;;  %v375_v7 = vld [vmem:[%s2055_s2 + $0x3b0] sm:$0xff] }
  0x26   : > { %456 = vmatpush.msra.mxu2 %v291_v46  ;;  %476 = vmatpush.msra.mxu3 %v292_v47  ;;  %v376_v8 = vld [vmem:[%s2055_s2 + $0x3b8] sm:$0xff]  ;;  %v365_v9 = vld [vmem:[%s2055_s2 + $0x360] sm:$0xff]  ;;  %v366_v10 = vld [vmem:[%s2055_s2 + $0x368] sm:$0xff] }
  0x27   : > { %417 = vmatpush.msra.mxu0 %v281_v48  ;;  %437 = vmatpush.msra.mxu1 %v282_v49  ;;  %v367_v11 = vld [vmem:[%s2055_s2 + $0x370] sm:$0xff]  ;;  %v368_v12 = vld [vmem:[%s2055_s2 + $0x378] sm:$0xff]  ;;  %v357_v13 = vld [vmem:[%s2055_s2 + $0x320] sm:$0xff] }
  0x28   : > { %457 = vmatpush.msra.mxu2 %v283_v50  ;;  %477 = vmatpush.msra.mxu3 %v284_v51  ;;  %v358_v14 = vld [vmem:[%s2055_s2 + $0x328] sm:$0xff]  ;;  %v359_v15 = vld [vmem:[%s2055_s2 + $0x330] sm:$0xff]  ;;  %v360_v16 = vld [vmem:[%s2055_s2 + $0x338] sm:$0xff] }
  0x29   : > { %418 = vmatpush.msra.mxu0 %v273_v52  ;;  %438 = vmatpush.msra.mxu1 %v274_v53  ;;  %v349_v17 = vld [vmem:[%s2055_s2 + $0x2e0] sm:$0xff]  ;;  %v350_v18 = vld [vmem:[%s2055_s2 + $0x2e8] sm:$0xff]  ;;  %v351_v19 = vld [vmem:[%s2055_s2 + $0x2f0] sm:$0xff] }
  0x2a   : > { %458 = vmatpush.msra.mxu2 %v275_v54  ;;  %478 = vmatpush.msra.mxu3 %v276_v55  ;;  %v352_v20 = vld [vmem:[%s2055_s2 + $0x2f8] sm:$0xff]  ;;  %v342_v21 = vld [vmem:[%s2055_s2 + $0x2a8] sm:$0xff]  ;;  %v341_v22 = vld [vmem:[%s2055_s2 + $0x2a0] sm:$0xff] }
  0x2b   : > { %419 = vmatpush.msra.mxu0 %v265_v56  ;;  %439 = vmatpush.msra.mxu1 %v266_v57  ;;  %v343_v23 = vld [vmem:[%s2055_s2 + $0x2b0] sm:$0xff]  ;;  %v344_v24 = vld [vmem:[%s2055_s2 + $0x2b8] sm:$0xff]  ;;  %v333_v25 = vld [vmem:[%s2055_s2 + $0x260] sm:$0xff] }
  0x2c   : > { %459 = vmatpush.msra.mxu2 %v267_v58  ;;  %479 = vmatpush.msra.mxu3 %v268_v59  ;;  %v334_v26 = vld [vmem:[%s2055_s2 + $0x268] sm:$0xff]  ;;  %v335_v27 = vld [vmem:[%s2055_s2 + $0x270] sm:$0xff]  ;;  %v336_v28 = vld [vmem:[%s2055_s2 + $0x278] sm:$0xff] }
  0x2d   : > { %420 = vmatpush.msra.mxu0 %v257_v60  ;;  %440 = vmatpush.msra.mxu1 %v258_v61  ;;  %v325_v29 = vld [vmem:[%s2055_s2 + $0x220] sm:$0xff]  ;;  %v326_v30 = vld [vmem:[%s2055_s2 + $0x228] sm:$0xff]  ;;  %v327_v31 = vld [vmem:[%s2055_s2 + $0x230] sm:$0xff] }
  0x2e   : > { %460 = vmatpush.msra.mxu2 %v259_v62  ;;  %480 = vmatpush.msra.mxu3 %v260_v63  ;;  %v328_v32 = vld [vmem:[%s2055_s2 + $0x238] sm:$0xff]  ;;  %v317_v33 = vld [vmem:[%s2055_s2 + $0x1e0] sm:$0xff]  ;;  %v318_v34 = vld [vmem:[%s2055_s2 + $0x1e8] sm:$0xff] }
  0x2f   : > { %485 = vmatpush.msrb.mxu0 %v381_v0  ;;  %505 = vmatpush.msrb.mxu1 %v382_v1  ;;  %v319_v35 = vld [vmem:[%s2055_s2 + $0x1f0] sm:$0xff]  ;;  %v320_v36 = vld [vmem:[%s2055_s2 + $0x1f8] sm:$0xff]  ;;  %v309_v37 = vld [vmem:[%s2055_s2 + $0x1a0] sm:$0xff] }
  0x30   : > { %525 = vmatpush.msrb.mxu2 %v383_v2  ;;  %545 = vmatpush.msrb.mxu3 %v384_v3  ;;  %v310_v38 = vld [vmem:[%s2055_s2 + $0x1a8] sm:$0xff]  ;;  %v311_v39 = vld [vmem:[%s2055_s2 + $0x1b0] sm:$0xff]  ;;  %v312_v40 = vld [vmem:[%s2055_s2 + $0x1b8] sm:$0xff] }
  0x31   : > { %461 = vmatmul.f32.vlgmr.msra.gmra.mxu2 %v1414_v4  ;;  %486 = vmatpush.msrb.mxu0 %v373_v5  ;;  %v301_v41 = vld [vmem:[%s2055_s2 + $0x160] sm:$0xff]  ;;  %v302_v42 = vld [vmem:[%s2055_s2 + $0x168] sm:$0xff]  ;;  %v303_v43 = vld [vmem:[%s2055_s2 + $0x170] sm:$0xff] }
  0x32   : > { %506 = vmatpush.msrb.mxu1 %v374_v6  ;;  %526 = vmatpush.msrb.mxu2 %v375_v7  ;;  %v304_v44 = vld [vmem:[%s2055_s2 + $0x178] sm:$0xff]  ;;  %v293_v45 = vld [vmem:[%s2055_s2 + $0x120] sm:$0xff]  ;;  %v294_v46 = vld [vmem:[%s2055_s2 + $0x128] sm:$0xff] }
  0x33   : > { %546 = vmatpush.msrb.mxu3 %v376_v8  ;;  %487 = vmatpush.msrb.mxu0 %v365_v9  ;;  %v295_v47 = vld [vmem:[%s2055_s2 + $0x130] sm:$0xff]  ;;  %v296_v48 = vld [vmem:[%s2055_s2 + $0x138] sm:$0xff]  ;;  %v285_v49 = vld [vmem:[%s2055_s2 + $0xe0] sm:$0xff] }
  0x34   : > { %481 = vmatmul.f32.vlgmr.msra.gmra.mxu3 %v1414_v4  ;;  %507 = vmatpush.msrb.mxu1 %v366_v10  ;;  %v286_v50 = vld [vmem:[%s2055_s2 + $0xe8] sm:$0xff]  ;;  %v287_v51 = vld [vmem:[%s2055_s2 + $0xf0] sm:$0xff]  ;;  %v288_v52 = vld [vmem:[%s2055_s2 + $0xf8] sm:$0xff] }
  0x35   : > { %527 = vmatpush.msrb.mxu2 %v367_v11  ;;  %547 = vmatpush.msrb.mxu3 %v368_v12  ;;  %v277_v53 = vld [vmem:[%s2055_s2 + $0xa0] sm:$0xff]  ;;  %v278_v54 = vld [vmem:[%s2055_s2 + $0xa8] sm:$0xff]  ;;  %v279_v55 = vld [vmem:[%s2055_s2 + $0xb0] sm:$0xff] }
  0x36   : > { %488 = vmatpush.msrb.mxu0 %v357_v13  ;;  %508 = vmatpush.msrb.mxu1 %v358_v14  ;;  %v280_v56 = vld [vmem:[%s2055_s2 + $0xb8] sm:$0xff]  ;;  %v269_v57 = vld [vmem:[%s2055_s2 + $0x60] sm:$0xff]  ;;  %v270_v58 = vld [vmem:[%s2055_s2 + $0x68] sm:$0xff] }
  0x37   : > { %528 = vmatpush.msrb.mxu2 %v359_v15  ;;  %548 = vmatpush.msrb.mxu3 %v360_v16  ;;  %v271_v59 = vld [vmem:[%s2055_s2 + $0x70] sm:$0xff]  ;;  %v272_v60 = vld [vmem:[%s2055_s2 + $0x78] sm:$0xff]  ;;  %v261_v61 = vld [vmem:[%s2055_s2 + $0x20] sm:$0xff] }
  0x38   : > { %489 = vmatpush.msrb.mxu0 %v349_v17  ;;  %509 = vmatpush.msrb.mxu1 %v350_v18  ;;  %v262_v62 = vld [vmem:[%s2055_s2 + $0x28] sm:$0xff]  ;;  %v263_v63 = vld [vmem:[%s2055_s2 + $0x30] sm:$0xff]  ;;  %v264_v0 = vld [vmem:[%s2055_s2 + $0x38] sm:$0xff] }
  0x39   : > { %529 = vmatpush.msrb.mxu2 %v351_v19  ;;  %549 = vmatpush.msrb.mxu3 %v352_v20  ;;  %v652_v1 = vld [vmem:[%s2056_s3 + $0x78] sm:$0xff]  ;;  %v651_v6 = vld [vmem:[%s2056_s3 + $0x70] sm:$0xff]  ;;  %v666_v10 = vld [vmem:[%s2056_s3 + $0xe8] sm:$0xff] }
  0x3a   : > { %421 = vmatmul.f32.vlgmr.msra.gmra.mxu0 %v1414_v4  ;;  %510 = vmatpush.msrb.mxu1 %v342_v21  ;;  %v668_v2 = vld [vmem:[%s2056_s3 + $0xf8] sm:$0xff]  ;;  %v667_v7 = vld [vmem:[%s2056_s3 + $0xf0] sm:$0xff]  ;;  %v682_v11 = vld [vmem:[%s2056_s3 + $0x168] sm:$0xff] }
  0x3b   : > { %490 = vmatpush.msrb.mxu0 %v341_v22  ;;  %530 = vmatpush.msrb.mxu2 %v343_v23  ;;  %v684_v3 = vld [vmem:[%s2056_s3 + $0x178] sm:$0xff]  ;;  %v683_v8 = vld [vmem:[%s2056_s3 + $0x170] sm:$0xff]  ;;  %v698_v12 = vld [vmem:[%s2056_s3 + $0x1e8] sm:$0xff] }
  0x3c   : > { %550 = vmatpush.msrb.mxu3 %v344_v24  ;;  %441 = vmatmul.f32.vlgmr.msra.gmra.mxu1 %v1414_v4  ;;  %v700_v5 = vld [vmem:[%s2056_s3 + $0x1f8] sm:$0xff]  ;;  %v699_v9 = vld [vmem:[%s2056_s3 + $0x1f0] sm:$0xff]  ;;  %v649_v13 = vld [vmem:[%s2056_s3 + $0x60] sm:$0xff] }
  0x3d   : > { %491 = vmatpush.msrb.mxu0 %v333_v25  ;;  %511 = vmatpush.msrb.mxu1 %v334_v26  ;;  %v665_v14 = vld [vmem:[%s2056_s3 + $0xe0] sm:$0xff]  ;;  %v648_v17 = vld [vmem:[%s2056_s3 + $0x58] sm:$0xff]  ;;  %v647_v19 = vld [vmem:[%s2056_s3 + $0x50] sm:$0xff] }
  0x3e   : > { %531 = vmatpush.msrb.mxu2 %v335_v27  ;;  %551 = vmatpush.msrb.mxu3 %v336_v28  ;;  %v681_v15 = vld [vmem:[%s2056_s3 + $0x160] sm:$0xff]  ;;  %v664_v18 = vld [vmem:[%s2056_s3 + $0xd8] sm:$0xff]  ;;  %v663_v20 = vld [vmem:[%s2056_s3 + $0xd0] sm:$0xff] }
  0x3f   : > { %492 = vmatpush.msrb.mxu0 %v325_v29  ;;  %512 = vmatpush.msrb.mxu1 %v326_v30  ;;  %v697_v16 = vld [vmem:[%s2056_s3 + $0x1e0] sm:$0xff]  ;;  %v646_v21 = vld [vmem:[%s2056_s3 + $0x48] sm:$0xff]  ;;  %v680_v25 = vld [vmem:[%s2056_s3 + $0x158] sm:$0xff] }
  0x40   : > { %532 = vmatpush.msrb.mxu2 %v327_v31  ;;  %552 = vmatpush.msrb.mxu3 %v328_v32  ;;  %v662_v22 = vld [vmem:[%s2056_s3 + $0xc8] sm:$0xff]  ;;  %v645_v23 = vld [vmem:[%s2056_s3 + $0x40] sm:$0xff]  ;;  %v696_v26 = vld [vmem:[%s2056_s3 + $0x1d8] sm:$0xff] }
  0x41   : > { %493 = vmatpush.msrb.mxu0 %v317_v33  ;;  %513 = vmatpush.msrb.mxu1 %v318_v34  ;;  %v661_v24 = vld [vmem:[%s2056_s3 + $0xc0] sm:$0xff]  ;;  %v644_v27 = vld [vmem:[%s2056_s3 + $0x38] sm:$0xff]  ;;  %v679_v29 = vld [vmem:[%s2056_s3 + $0x150] sm:$0xff] }
  0x42   : > { %533 = vmatpush.msrb.mxu2 %v319_v35  ;;  %553 = vmatpush.msrb.mxu3 %v320_v36  ;;  %v660_v28 = vld [vmem:[%s2056_s3 + $0xb8] sm:$0xff]  ;;  %v695_v30 = vld [vmem:[%s2056_s3 + $0x1d0] sm:$0xff]  ;;  %v678_v33 = vld [vmem:[%s2056_s3 + $0x148] sm:$0xff] }
  0x43   : > { %494 = vmatpush.msrb.mxu0 %v309_v37  ;;  %514 = vmatpush.msrb.mxu1 %v310_v38  ;;  %v643_v31 = vld [vmem:[%s2056_s3 + $0x30] sm:$0xff]  ;;  %v694_v34 = vld [vmem:[%s2056_s3 + $0x1c8] sm:$0xff]  ;;  %v677_v37 = vld [vmem:[%s2056_s3 + $0x140] sm:$0xff] }
  0x44   : > { %534 = vmatpush.msrb.mxu2 %v311_v39  ;;  %554 = vmatpush.msrb.mxu3 %v312_v40  ;;  %v659_v32 = vld [vmem:[%s2056_s3 + $0xb0] sm:$0xff]  ;;  %v642_v35 = vld [vmem:[%s2056_s3 + $0x28] sm:$0xff]  ;;  %v693_v38 = vld [vmem:[%s2056_s3 + $0x1c0] sm:$0xff] }
  0x45   : > { %495 = vmatpush.msrb.mxu0 %v301_v41  ;;  %515 = vmatpush.msrb.mxu1 %v302_v42  ;;  %v658_v36 = vld [vmem:[%s2056_s3 + $0xa8] sm:$0xff]  ;;  %v641_v39 = vld [vmem:[%s2056_s3 + $0x20] sm:$0xff]  ;;  %v676_v41 = vld [vmem:[%s2056_s3 + $0x138] sm:$0xff] }
  0x46   : > { %535 = vmatpush.msrb.mxu2 %v303_v43  ;;  %555 = vmatpush.msrb.mxu3 %v304_v44  ;;  %v657_v40 = vld [vmem:[%s2056_s3 + $0xa0] sm:$0xff]  ;;  %v692_v42 = vld [vmem:[%s2056_s3 + $0x1b8] sm:$0xff] }
  0x47   : > { %496 = vmatpush.msrb.mxu0 %v293_v45  ;;  %516 = vmatpush.msrb.mxu1 %v294_v46  ;;  %v640_v43 = vld [vmem:[%s2056_s3 + $0x18] sm:$0xff]  ;;  %v675_v45 = vld [vmem:[%s2056_s3 + $0x130] sm:$0xff] }
  0x48   : > { %536 = vmatpush.msrb.mxu2 %v295_v47  ;;  %556 = vmatpush.msrb.mxu3 %v296_v48  ;;  %v656_v44 = vld [vmem:[%s2056_s3 + $0x98] sm:$0xff]  ;;  %v691_v46 = vld [vmem:[%s2056_s3 + $0x1b0] sm:$0xff] }
  0x49   : > { %497 = vmatpush.msrb.mxu0 %v285_v49  ;;  %517 = vmatpush.msrb.mxu1 %v286_v50  ;;  %v639_v47 = vld [vmem:[%s2056_s3 + $0x10] sm:$0xff]  ;;  %v674_v49 = vld [vmem:[%s2056_s3 + $0x128] sm:$0xff] }
  0x4a   : > { %537 = vmatpush.msrb.mxu2 %v287_v51  ;;  %557 = vmatpush.msrb.mxu3 %v288_v52  ;;  %v655_v48 = vld [vmem:[%s2056_s3 + $0x90] sm:$0xff]  ;;  %v690_v50 = vld [vmem:[%s2056_s3 + $0x1a8] sm:$0xff] }
  0x4b   : > { %498 = vmatpush.msrb.mxu0 %v277_v53  ;;  %518 = vmatpush.msrb.mxu1 %v278_v54  ;;  %v638_v51 = vld [vmem:[%s2056_s3 + $0x8] sm:$0xff]  ;;  %v673_v53 = vld [vmem:[%s2056_s3 + $0x120] sm:$0xff] }
  0x4c   : > { %538 = vmatpush.msrb.mxu2 %v279_v55  ;;  %558 = vmatpush.msrb.mxu3 %v280_v56  ;;  %v654_v52 = vld [vmem:[%s2056_s3 + $0x88] sm:$0xff]  ;;  %v689_v54 = vld [vmem:[%s2056_s3 + $0x1a0] sm:$0xff] }
  0x4d   : > { %499 = vmatpush.msrb.mxu0 %v269_v57  ;;  %519 = vmatpush.msrb.mxu1 %v270_v58  ;;  %v637_v55 = vld [vmem:[%s2056_s3] sm:$0xff]  ;;  %v672_v57 = vld [vmem:[%s2056_s3 + $0x118] sm:$0xff] }
  0x4e   : > { %539 = vmatpush.msrb.mxu2 %v271_v59  ;;  %559 = vmatpush.msrb.mxu3 %v272_v60  ;;  %v653_v56 = vld [vmem:[%s2056_s3 + $0x80] sm:$0xff]  ;;  %v688_v58 = vld [vmem:[%s2056_s3 + $0x198] sm:$0xff] }
  0x4f   : > { %500 = vmatpush.msrb.mxu0 %v261_v61  ;;  %520 = vmatpush.msrb.mxu1 %v262_v62  ;;  %v716_v59 = vld [vmem:[%s2056_s3 + $0x278] sm:$0xff]  ;;  %v671_v61 = vld [vmem:[%s2056_s3 + $0x110] sm:$0xff] }
  0x50   : > { %540 = vmatpush.msrb.mxu2 %v263_v63  ;;  %560 = vmatpush.msrb.mxu3 %v264_v0  ;;  %v732_v60 = vld [vmem:[%s2056_s3 + $0x2f8] sm:$0xff]  ;;  %v687_v62 = vld [vmem:[%s2056_s3 + $0x190] sm:$0xff] }
  0x51   : > { %501 = vmatmul.f32.vlgmr.msrb.gmra.mxu0 %v1414_v4  ;;  %521 = vmatmul.f32.vlgmr.msrb.gmra.mxu1 %v1414_v4  ;;  %v715_v63 = vld [vmem:[%s2056_s3 + $0x270] sm:$0xff] }
  0x52   : > { %541 = vmatmul.f32.vlgmr.msrb.gmra.mxu2 %v1414_v4  ;;  %561 = vmatmul.f32.vlgmr.msrb.gmra.mxu3 %v1414_v4  ;;  %v650_v4 = vld [vmem:[%s2056_s3 + $0x68] sm:$0xff]  ;;  %v731_v0 = vld [vmem:[%s2056_s3 + $0x2f0] sm:$0xff] }
  0x53   : > { %769 = vmatpush.msra.mxu0 %v652_v1  ;;  %789 = vmatpush.msra.mxu1 %v668_v2  ;;  %v670_v1 = vld [vmem:[%s2056_s3 + $0x108] sm:$0xff] }
  0x54   : > { %809 = vmatpush.msra.mxu2 %v684_v3  ;;  %829 = vmatpush.msra.mxu3 %v700_v5  ;;  %v686_v2 = vld [vmem:[%s2056_s3 + $0x188] sm:$0xff] }
  0x55   : > { %770 = vmatpush.msra.mxu0 %v651_v6  ;;  %790 = vmatpush.msra.mxu1 %v667_v7  ;;  %v714_v3 = vld [vmem:[%s2056_s3 + $0x268] sm:$0xff]  ;;  %v1812_v6 = vld [vmem:[%s386_s13] sm:$0xff] }
  0x56   : > { %810 = vmatpush.msra.mxu2 %v683_v8  ;;  %830 = vmatpush.msra.mxu3 %v699_v9  ;;  %v730_v5 = vld [vmem:[%s2056_s3 + $0x2e8] sm:$0xff]  ;;  %v669_v7 = vld [vmem:[%s2056_s3 + $0x100] sm:$0xff] }
  0x57   : > { %771 = vmatpush.msra.mxu0 %v650_v4  ;;  %791 = vmatpush.msra.mxu1 %v666_v10  ;;  %v685_v8 = vld [vmem:[%s2056_s3 + $0x180] sm:$0xff]  ;;  %v748_v10 = vld [vmem:[%s2056_s3 + $0x378] sm:$0xff] }
  0x58   : > { %811 = vmatpush.msra.mxu2 %v682_v11  ;;  %831 = vmatpush.msra.mxu3 %v698_v12  ;;  %v713_v9 = vld [vmem:[%s2056_s3 + $0x260] sm:$0xff]  ;;  %v764_v11 = vld [vmem:[%s2056_s3 + $0x3f8] sm:$0xff]  ;;  %v391_v12 = vperm.slane %v1812_v6, 2 }
  0x59   : > { %772 = vmatpush.msra.mxu0 %v649_v13  ;;  %792 = vmatpush.msra.mxu1 %v665_v14  ;;  %v729_v4 = vld [vmem:[%s2056_s3 + $0x2e0] sm:$0xff]  ;;  %v712_v13 = vld [vmem:[%s2056_s3 + $0x258] sm:$0xff] }
  0x5a   : > { %812 = vmatpush.msra.mxu2 %v681_v15  ;;  %832 = vmatpush.msra.mxu3 %v697_v16  ;;  %v728_v14 = vld [vmem:[%s2056_s3 + $0x2d8] sm:$0xff]  ;;  %v747_v15 = vld [vmem:[%s2056_s3 + $0x370] sm:$0xff] }
  0x5b   : > { %773 = vmatpush.msra.mxu0 %v648_v17  ;;  %793 = vmatpush.msra.mxu1 %v664_v18  ;;  %v763_v16 = vld [vmem:[%s2056_s3 + $0x3f0] sm:$0xff] }
  0x5c   : > { %813 = vmatpush.msra.mxu2 %v680_v25  ;;  %833 = vmatpush.msra.mxu3 %v696_v26  ;;  %v711_v17 = vld [vmem:[%s2056_s3 + $0x250] sm:$0xff]  ;;  %v390_v25 = vperm.slane %v1812_v6, 1  ;;  %v710_v26 = vld [vmem:[%s2056_s3 + $0x248] sm:$0xff] }
  0x5d   : > { %774 = vmatpush.msra.mxu0 %v647_v19  ;;  %794 = vmatpush.msra.mxu1 %v663_v20  ;;  %v727_v18 = vld [vmem:[%s2056_s3 + $0x2d0] sm:$0xff]  ;;  %v746_v19 = vld [vmem:[%s2056_s3 + $0x368] sm:$0xff] }
  0x5e   : > { %814 = vmatpush.msra.mxu2 %v679_v29  ;;  %834 = vmatpush.msra.mxu3 %v695_v30 }
  0x5f   : > { %775 = vmatpush.msra.mxu0 %v646_v21  ;;  %795 = vmatpush.msra.mxu1 %v662_v22  ;;  %v389_v21 = vperm.slane %v1812_v6, 0  ;;  %v392_v22 = vperm.slane %v1812_v6, 3 }
  0x60   : > { %815 = vmatpush.msra.mxu2 %v678_v33  ;;  %835 = vmatpush.msra.mxu3 %v694_v34 }
  0x61   : > { %776 = vmatpush.msra.mxu0 %v645_v23  ;;  %796 = vmatpush.msra.mxu1 %v661_v24  ;;  %v762_v23 = vld [vmem:[%s2056_s3 + $0x3e8] sm:$0xff] }
  0x62   : > { %816 = vmatpush.msra.mxu2 %v677_v37  ;;  %836 = vmatpush.msra.mxu3 %v693_v38  ;;  %v744_v37 = vld [vmem:[%s2056_s3 + $0x358] sm:$0xff] }
  0x63   : > { %777 = vmatpush.msra.mxu0 %v644_v27  ;;  %797 = vmatpush.msra.mxu1 %v660_v28  ;;  %v726_v27 = vld [vmem:[%s2056_s3 + $0x2c8] sm:$0xff]  ;;  %v745_v28 = vld [vmem:[%s2056_s3 + $0x360] sm:$0xff] }
  0x64   : > { %817 = vmatpush.msra.mxu2 %v676_v41  ;;  %837 = vmatpush.msra.mxu3 %v692_v42 }
  0x65   : > { %778 = vmatpush.msra.mxu0 %v643_v31  ;;  %798 = vmatpush.msra.mxu1 %v659_v32  ;;  %v761_v32 = vld [vmem:[%s2056_s3 + $0x3e0] sm:$0xff] }
  0x66   : > { %818 = vmatpush.msra.mxu2 %v675_v45  ;;  %838 = vmatpush.msra.mxu3 %v691_v46  ;;  %v724_v45 = vld [vmem:[%s2056_s3 + $0x2b8] sm:$0xff]  ;;  %v743_v46 = vld [vmem:[%s2056_s3 + $0x350] sm:$0xff] }
  0x67   : > { %779 = vmatpush.msra.mxu0 %v642_v35  ;;  %799 = vmatpush.msra.mxu1 %v658_v36  ;;  %v709_v35 = vld [vmem:[%s2056_s3 + $0x240] sm:$0xff] }
  0x68   : > { %819 = vmatpush.msra.mxu2 %v674_v49  ;;  %839 = vmatpush.msra.mxu3 %v690_v50  ;;  %v725_v36 = vld [vmem:[%s2056_s3 + $0x2c0] sm:$0xff] }
  0x69   : > { %780 = vmatpush.msra.mxu0 %v641_v39  ;;  %800 = vmatpush.msra.mxu1 %v657_v40  ;;  %v760_v40 = vld [vmem:[%s2056_s3 + $0x3d8] sm:$0xff] }
  0x6a   : > { %820 = vmatpush.msra.mxu2 %v673_v53  ;;  %840 = vmatpush.msra.mxu3 %v689_v54  ;;  %v723_v53 = vld [vmem:[%s2056_s3 + $0x2b0] sm:$0xff]  ;;  %v742_v54 = vld [vmem:[%s2056_s3 + $0x348] sm:$0xff] }
  0x6b   : > { %781 = vmatpush.msra.mxu0 %v640_v43  ;;  %801 = vmatpush.msra.mxu1 %v656_v44  ;;  %v708_v44 = vld [vmem:[%s2056_s3 + $0x238] sm:$0xff] }
  0x6c   : > { %821 = vmatpush.msra.mxu2 %v672_v57  ;;  %841 = vmatpush.msra.mxu3 %v688_v58 }
  0x6d   : > { %782 = vmatpush.msra.mxu0 %v639_v47  ;;  %802 = vmatpush.msra.mxu1 %v655_v48  ;;  %v759_v48 = vld [vmem:[%s2056_s3 + $0x3d0] sm:$0xff] }
  0x6e   : > { %822 = vmatpush.msra.mxu2 %v671_v61  ;;  %842 = vmatpush.msra.mxu3 %v687_v62  ;;  %v722_v61 = vld [vmem:[%s2056_s3 + $0x2a8] sm:$0xff] }
  0x6f   : > { %783 = vmatpush.msra.mxu0 %v638_v51  ;;  %803 = vmatpush.msra.mxu1 %v654_v52  ;;  %v707_v52 = vld [vmem:[%s2056_s3 + $0x230] sm:$0xff] }
  0x70   : > { %823 = vmatpush.msra.mxu2 %v670_v1  ;;  %843 = vmatpush.msra.mxu3 %v686_v2 }
  0x71   : > { %784 = vmatpush.msra.mxu0 %v637_v55  ;;  %804 = vmatpush.msra.mxu1 %v653_v56  ;;  %v758_v56 = vld [vmem:[%s2056_s3 + $0x3c8] sm:$0xff] }
  0x72   : > { %824 = vmatpush.msra.mxu2 %v669_v7  ;;  %844 = vmatpush.msra.mxu3 %v685_v8  ;;  %v721_v7 = vld [vmem:[%s2056_s3 + $0x2a0] sm:$0xff]  ;;  %v740_v8 = vld [vmem:[%s2056_s3 + $0x338] sm:$0xff] }
  0x73   : > { %849 = vmatpush.msrb.mxu0 %v716_v59  ;;  %869 = vmatpush.msrb.mxu1 %v732_v60  ;;  %v706_v60 = vld [vmem:[%s2056_s3 + $0x228] sm:$0xff] }
  0x74   : > { %889 = vmatpush.msrb.mxu2 %v748_v10  ;;  %909 = vmatpush.msrb.mxu3 %v764_v11 }
  0x75   : > { %850 = vmatpush.msrb.mxu0 %v715_v63  ;;  %870 = vmatpush.msrb.mxu1 %v731_v0  ;;  %v741_v63 = vld [vmem:[%s2056_s3 + $0x340] sm:$0xff] }
  0x76   : > { %890 = vmatpush.msrb.mxu2 %v747_v15  ;;  %910 = vmatpush.msrb.mxu3 %v763_v16  ;;  %v757_v0 = vld [vmem:[%s2056_s3 + $0x3c0] sm:$0xff]  ;;  %v755_v15 = vld [vmem:[%s2056_s3 + $0x3b0] sm:$0xff] }
  0x77   : > { %851 = vmatpush.msrb.mxu0 %v714_v3  ;;  %871 = vmatpush.msrb.mxu1 %v730_v5  ;;  %v705_v5 = vld [vmem:[%s2056_s3 + $0x220] sm:$0xff]  ;;  %v703_v16 = vld [vmem:[%s2056_s3 + $0x210] sm:$0xff] }
  0x78   : > { %891 = vmatpush.msrb.mxu2 %v746_v19  ;;  %911 = vmatpush.msrb.mxu3 %v762_v23  ;;  %v738_v19 = vld [vmem:[%s2056_s3 + $0x328] sm:$0xff]  ;;  %v737_v23 = vld [vmem:[%s2056_s3 + $0x320] sm:$0xff] }
  0x79   : > { %852 = vmatpush.msrb.mxu0 %v713_v9  ;;  %872 = vmatpush.msrb.mxu1 %v729_v4  ;;  %v756_v9 = vld [vmem:[%s2056_s3 + $0x3b8] sm:$0xff] }
  0x7a   : > { %892 = vmatpush.msrb.mxu2 %v745_v28  ;;  %912 = vmatpush.msrb.mxu3 %v761_v32  ;;  %v735_v32 = vld [vmem:[%s2056_s3 + $0x310] sm:$0xff] }
  0x7b   : > { %853 = vmatpush.msrb.mxu0 %v712_v13  ;;  %873 = vmatpush.msrb.mxu1 %v728_v14  ;;  %v720_v13 = vld [vmem:[%s2056_s3 + $0x298] sm:$0xff]  ;;  %v739_v14 = vld [vmem:[%s2056_s3 + $0x330] sm:$0xff] }
  0x7c   : > { %893 = vmatpush.msrb.mxu2 %v744_v37  ;;  %913 = vmatpush.msrb.mxu3 %v760_v40  ;;  %v394_v40 = vperm.slane %v1812_v6, 5 }
  0x7d   : > { %854 = vmatpush.msrb.mxu0 %v711_v17  ;;  %874 = vmatpush.msrb.mxu1 %v727_v18  ;;  %v719_v18 = vld [vmem:[%s2056_s3 + $0x290] sm:$0xff] }
  0x7e   : > { %894 = vmatpush.msrb.mxu2 %v743_v46  ;;  %914 = vmatpush.msrb.mxu3 %v759_v48 }
  0x7f   : > { %855 = vmatpush.msrb.mxu0 %v710_v26  ;;  %875 = vmatpush.msrb.mxu1 %v726_v27  ;;  %v701_v26 = vld [vmem:[%s2056_s3 + $0x200] sm:$0xff] }
  0x80   : > { %895 = vmatpush.msrb.mxu2 %v742_v54  ;;  %915 = vmatpush.msrb.mxu3 %v758_v56  ;;  %v717_v27 = vld [vmem:[%s2056_s3 + $0x280] sm:$0xff] }
  0x81   : > { %856 = vmatpush.msrb.mxu0 %v709_v35  ;;  %876 = vmatpush.msrb.mxu1 %v725_v36  ;;  %v751_v35 = vld [vmem:[%s2056_s3 + $0x390] sm:$0xff] }
  0x82   : > { %896 = vmatpush.msrb.mxu2 %v741_v63  ;;  %916 = vmatpush.msrb.mxu3 %v757_v0  ;;  %v396_v63 = vperm.slane %v1812_v6, 7 }
  0x83   : > { %857 = vmatpush.msrb.mxu0 %v708_v44  ;;  %877 = vmatpush.msrb.mxu1 %v724_v45 }
  0x84   : > { %897 = vmatpush.msrb.mxu2 %v740_v8  ;;  %917 = vmatpush.msrb.mxu3 %v756_v9 }
  0x85   : > { %858 = vmatpush.msrb.mxu0 %v707_v52  ;;  %878 = vmatpush.msrb.mxu1 %v723_v53 }
  0x86   : > { %898 = vmatpush.msrb.mxu2 %v739_v14  ;;  %918 = vmatpush.msrb.mxu3 %v755_v15 }
  0x87   : > { %859 = vmatpush.msrb.mxu0 %v706_v60  ;;  %879 = vmatpush.msrb.mxu1 %v722_v61 }
  0x88   : > { %899 = vmatpush.msrb.mxu2 %v738_v19 }
  0x89   : > { %860 = vmatpush.msrb.mxu0 %v705_v5  ;;  %880 = vmatpush.msrb.mxu1 %v721_v7 }
  0x8a   : > { %900 = vmatpush.msrb.mxu2 %v737_v23 }
  0x8b   : > { %881 = vmatpush.msrb.mxu1 %v720_v13 }
  0x8d   : > { %882 = vmatpush.msrb.mxu1 %v719_v18 }
  0xb4   : > { %v462_v20 = vpop.f32.mrf.mxu2 }
  0xb5   : > { %v1859_v24 = vadd.f32 %v462_v20, %v391_v12  ;;  %v704_v12 = vld [vmem:[%s2056_s3 + $0x218] sm:$0xff]  ;;  %v754_v20 = vld [vmem:[%s2056_s3 + $0x3a8] sm:$0xff] }
  0xb6   : > { %861 = vmatpush.msrb.mxu0 %v704_v12  ;;  %919 = vmatpush.msrb.mxu3 %v754_v20 }
  0xb7   : > { %v567_v29 = vmul.f32 %v1859_v24, %v1859_v24  ;;  %v422_v30 = vpop.f32.mrf.mxu0  ;;  %v482_v31 = vpop.f32.mrf.mxu3 }
  0xb8   : > { %v1876_v33 = vadd.f32 %v422_v30, %v389_v21  ;;  %v1878_v34 = vadd.f32 %v482_v31, %v392_v22  ;;  %862 = vmatpush.msrb.mxu0 %v703_v16  ;;  %v702_v21 = vld [vmem:[%s2056_s3 + $0x208] sm:$0xff]  ;;  %v752_v30 = vld [vmem:[%s2056_s3 + $0x398] sm:$0xff] }
  0xb9   : > { %v575_v38 = vmul.f32 %v567_v29, %v1859_v24  ;;  %v442_v39 = vpop.f32.mrf.mxu1  ;;  %v718_v22 = vld [vmem:[%s2056_s3 + $0x288] sm:$0xff]  ;;  %v736_v29 = vld [vmem:[%s2056_s3 + $0x318] sm:$0xff] }
  0xba   : > { %v565_v41 = vmul.f32 %v1876_v33, %v1876_v33  ;;  %v568_v42 = vmul.f32 %v1878_v34, %v1878_v34  ;;  %v1897_v43 = vadd.f32 %v442_v39, %v390_v25  ;;  %v753_v25 = vld [vmem:[%s2056_s3 + $0x3a0] sm:$0xff]  ;;  %863 = vmatpush.msrb.mxu0 %v702_v21  ;;  %883 = vmatpush.msrb.mxu1 %v718_v22  ;;  %v393_v39 = vperm.slane %v1812_v6, 4 }
  0xbb   : > { %v583_v47 = vmul.f32 0.044715, %v575_v38  ;;  %920 = vmatpush.msrb.mxu3 %v753_v25  ;;  %901 = vmatpush.msrb.mxu2 %v736_v29 }
  0xbc   : > { %v573_v49 = vmul.f32 %v565_v41, %v1876_v33  ;;  %v576_v50 = vmul.f32 %v568_v42, %v1878_v34  ;;  %v566_v51 = vmul.f32 %v1897_v43, %v1897_v43  ;;  %864 = vmatpush.msrb.mxu0 %v701_v26  ;;  %884 = vmatpush.msrb.mxu1 %v717_v27  ;;  %v750_v42 = vld [vmem:[%s2056_s3 + $0x388] sm:$0xff] }
  0xbd   : > { %v591_v55 = vadd.f32 %v583_v47, %v1859_v24  ;;  %921 = vmatpush.msrb.mxu3 %v752_v30  ;;  %902 = vmatpush.msrb.mxu2 %v735_v32  ;;  %v734_v47 = vld [vmem:[%s2056_s3 + $0x308] sm:$0xff] }
  0xbe   : > { %v581_v57 = vmul.f32 0.044715, %v573_v49  ;;  %v584_v58 = vmul.f32 0.044715, %v576_v50  ;;  %v574_v59 = vmul.f32 %v566_v51, %v1897_v43  ;;  %v749_v50 = vld [vmem:[%s2056_s3 + $0x380] sm:$0xff] }
  0xbf   : > { %v599_v62 = vmul.f32 0.7978846, %v591_v55  ;;  %922 = vmatpush.msrb.mxu3 %v751_v35  ;;  %903 = vmatpush.msrb.mxu2 %v734_v47 }
  0xc0   : > { %v589_v1 = vadd.f32 %v581_v57, %v1876_v33  ;;  %v592_v2 = vadd.f32 %v584_v58, %v1878_v34  ;;  %v582_v3 = vmul.f32 0.044715, %v574_v59 }
  0xc1   : > { %1071 = vtanh.f32 %v599_v62  ;;  %923 = vmatpush.msrb.mxu3 %v750_v42  ;;  %v395_v62 = vperm.slane %v1812_v6, 6 }
  0xc2   : > { %v597_v4 = vmul.f32 0.7978846, %v589_v1  ;;  %v600_v10 = vmul.f32 0.7978846, %v592_v2  ;;  %v590_v11 = vadd.f32 %v582_v3, %v1897_v43 }
  0xc3   : > { %924 = vmatpush.msrb.mxu3 %v749_v50 }
  0xc4   : > { %1073 = vtanh.f32 %v597_v4  ;;  %v598_v17 = vmul.f32 0.7978846, %v590_v11 }
  0xc5   : > { %1075 = vtanh.f32 %v600_v10 }
  0xc6   : > { %1077 = vtanh.f32 %v598_v17 }
  0xc7   : > { %v1072_v28 = vpop.eup %1071 }
  0xc8   : > { %v615_v31 = vadd.f32 1.0, %v1072_v28 }
  0xca   : > { %v1074_v36 = vpop.eup %1073  ;;  %v623_v37 = vmul.f32 0.5, %v615_v31 }
  0xcb   : > { %v1076_v38 = vpop.eup %1075  ;;  %v613_v41 = vadd.f32 1.0, %v1074_v36 }
  0xcc   : > { %v1078_v44 = vpop.eup %1077  ;;  %v631_v45 = vmul.f32 %v623_v37, %v1859_v24  ;;  %v616_v46 = vadd.f32 1.0, %v1076_v38  ;;  %v733_v24 = vld [vmem:[%s2056_s3 + $0x300] sm:$0xff] }
  0xcd   : > { %v621_v48 = vmul.f32 0.5, %v613_v41  ;;  %v614_v49 = vadd.f32 1.0, %v1078_v44  ;;  %904 = vmatpush.msrb.mxu2 %v733_v24  ;;  %v1070_v38 = vld [vmem:[%s2057_s4] ss:$0 sm:$0xff] }
  0xce   : > { %v502_v51 = vpop.f32.mrf.mxu0  ;;  %v522_v52 = vpop.f32.mrf.mxu1  ;;  %825 = vmatmul.f32.vlgmr.msra.gmra.mxu2 %v631_v45  ;;  %v624_v53 = vmul.f32 0.5, %v616_v46 }
  0xcf   : > { %v503_v54 = vadd.f32 %v502_v51, %v393_v39  ;;  %v523_v55 = vadd.f32 %v522_v52, %v394_v40  ;;  %v629_v56 = vmul.f32 %v621_v48, %v1876_v33  ;;  %v622_v57 = vmul.f32 0.5, %v614_v49 }
  0xd0   : > { %v632_v58 = vmul.f32 %v624_v53, %v1878_v34 }
  0xd1   : > { %v569_v59 = vmul.f32 %v503_v54, %v503_v54  ;;  %v570_v60 = vmul.f32 %v523_v55, %v523_v55  ;;  %785 = vmatmul.f32.vlgmr.msra.gmra.mxu0 %v629_v56  ;;  %v630_v61 = vmul.f32 %v622_v57, %v1897_v43 }
  0xd2   : > { %845 = vmatmul.f32.vlgmr.msra.gmra.mxu3 %v632_v58 }
  0xd3   : > { %v577_v0 = vmul.f32 %v569_v59, %v503_v54  ;;  %v578_v1 = vmul.f32 %v570_v60, %v523_v55  ;;  %805 = vmatmul.f32.vlgmr.msra.gmra.mxu1 %v630_v61 }
  0xd5   : > { %v585_v33 = vmul.f32 0.044715, %v577_v0  ;;  %v586_v2 = vmul.f32 0.044715, %v578_v1  ;;  %v542_v3 = vpop.f32.mrf.mxu2  ;;  %v562_v5 = vpop.f32.mrf.mxu3 }
  0xd6   : > { %v543_v34 = vadd.f32 %v542_v3, %v395_v62  ;;  %v563_v7 = vadd.f32 %v562_v5, %v396_v63 }
  0xd7   : > { %v593_v8 = vadd.f32 %v585_v33, %v503_v54  ;;  %v594_v9 = vadd.f32 %v586_v2, %v523_v55 }
  0xd8   : > { %v571_v4 = vmul.f32 %v543_v34, %v543_v34  ;;  %v572_v10 = vmul.f32 %v563_v7, %v563_v7 }
  0xd9   : > { %v601_v43 = vmul.f32 0.7978846, %v593_v8  ;;  %v602_v11 = vmul.f32 0.7978846, %v594_v9 }
  0xda   : > { %v579_v12 = vmul.f32 %v571_v4, %v543_v34  ;;  %v580_v13 = vmul.f32 %v572_v10, %v563_v7 }
  0xdb   : > { %1079 = vtanh.f32 %v601_v43 }
  0xdc   : > { %1081 = vtanh.f32 %v602_v11  ;;  %v587_v6 = vmul.f32 0.044715, %v579_v12  ;;  %v588_v14 = vmul.f32 0.044715, %v580_v13 }
  0xde   : > { %v595_v15 = vadd.f32 %v587_v6, %v543_v34  ;;  %v596_v16 = vadd.f32 %v588_v14, %v563_v7 }
  0xe0   : > { %v603_v17 = vmul.f32 0.7978846, %v595_v15  ;;  %v604_v18 = vmul.f32 0.7978846, %v596_v16 }
  0xe1   : > { %v1080_v19 = vpop.eup %1079 }
  0xe2   : > { %v1082_v20 = vpop.eup %1081  ;;  %1083 = vtanh.f32 %v603_v17  ;;  %v617_v21 = vadd.f32 1.0, %v1080_v19 }
  0xe3   : > { %1085 = vtanh.f32 %v604_v18  ;;  %v618_v22 = vadd.f32 1.0, %v1082_v20 }
  0xe4   : > { %v625_v23 = vmul.f32 0.5, %v617_v21 }
  0xe5   : > { %v626_v25 = vmul.f32 0.5, %v618_v22 }
  0xe6   : > { %v633_v26 = vmul.f32 %v625_v23, %v503_v54 }
  0xe7   : > { %v634_v27 = vmul.f32 %v626_v25, %v523_v55 }
  0xe8   : > { %v1084_v28 = vpop.eup %1083  ;;  %865 = vmatmul.f32.vlgmr.msrb.gmra.mxu0 %v633_v26 }
  0xe9   : > { %v1086_v29 = vpop.eup %1085  ;;  %885 = vmatmul.f32.vlgmr.msrb.gmra.mxu1 %v634_v27  ;;  %v619_v30 = vadd.f32 1.0, %v1084_v28 }
  0xea   : > { %v620_v31 = vadd.f32 1.0, %v1086_v29 }
  0xeb   : > { %v627_v32 = vmul.f32 0.5, %v619_v30 }
  0xec   : > { %v628_v35 = vmul.f32 0.5, %v620_v31 }
  0xed   : > { %v635_v36 = vmul.f32 %v627_v32, %v543_v34 }
  0xee   : > { %v636_v37 = vmul.f32 %v628_v35, %v563_v7 }
  0xef   : > { %905 = vmatmul.f32.vlgmr.msrb.gmra.mxu2 %v635_v36 }
  0xf0   : > { %925 = vmatmul.f32.vlgmr.msrb.gmra.mxu3 %v636_v37 }
 0x14e   : > { %v786_v39 = vpop.f32.mrf.mxu0 }
 0x14f   : > { %v787_v40 = vadd.f32 %v1070_v38, %v786_v39 }
 0x150   : > { %v806_v41 = vpop.f32.mrf.mxu1 }
 0x151   : > { %v807_v42 = vadd.f32 %v806_v41, %v787_v40  ;;  %v826_v44 = vpop.f32.mrf.mxu2 }
 0x153   : > { %v827_v45 = vadd.f32 %v826_v44, %v807_v42 }
 0x155   : > { %v846_v46 = vpop.f32.mrf.mxu3 }
 0x156   : > { %v847_v48 = vadd.f32 %v846_v46, %v827_v45 }
 0x165   : > { %v866_v47 = vpop.f32.mrf.mxu0 }
 0x166   : > { %v867_v49 = vadd.f32 %v866_v47, %v847_v48  ;;  %v886_v50 = vpop.f32.mrf.mxu1 }
 0x168   : > { %v887_v51 = vadd.f32 %v886_v50, %v867_v49 }
 0x172   : > { %v906_v52 = vpop.f32.mrf.mxu2 }
 0x173   : > { %v907_v53 = vadd.f32 %v906_v52, %v887_v51  ;;  %v926_v24 = vpop.f32.mrf.mxu3 }
 0x175   : > { %v927_v54 = vadd.f32 %v926_v24, %v907_v53 }
 0x177   : > { %929 = vst [vmem:[%s255_s19] sm:$0xff] %v927_v54 }
 0x178 PF: > { %s15_s22 = sadd.s32 1, %s1125_s22   ;;  %s2059_s18 = smov %s1117_s20 }
 0x179   : > { %p12_p7 = scmp.ge.s32.totalorder %s15_s22, 10   ;;  %s2060_s19 = smov %s1121_s21 }
 0x17a   : > { %s2061_s20 = smov %s2064_s23  ;;  %s2062_s21 = smov %s2068_s24 }
 0x17b   :  { %14 = sbr.rel (!%p12_p7) target bundleno = 3 (0x3), region = 71 }

</bundles_post_ra>
